<compile_context>
chip_gen: v7x
topology: tpu7x:2x2x1
jax: 0.10.0
libtpu: 0.0.40
codegen_flags: <defaults>
</compile_context>

<pallas_src>
import jax
import jax.numpy as jnp
from jax import lax
from jax.experimental import pallas as pl
from jax.experimental.pallas import tpu as pltpu


def _coords_update_kernel(a_ref, ei_row_ref, ej_row_ref, ei_col_ref,
                          coords_t_ref, w1t_ref, b1t_ref, w23_ref, b23_ref,
                          out_ref):
    step = pl.program_id(1)

    # Output block index is constant across the edge ("arbitrary") axis for a
    # given core -> it is this core's partial accumulator.
    @pl.when(step == 0)
    def _():
        out_ref[...] = jnp.zeros_like(out_ref)

    a_t = a_ref[...].astype(jnp.float32)        # (D, TE)   streamed as bf16
    idx_i_row = ei_row_ref[...]                 # (1, TE)   i32 (padded = -1)
    idx_j_row = ej_row_ref[...]                 # (1, TE)   i32
    idx_i_col = ei_col_ref[...]                 # (TE, 1)   i32
    coords_t = coords_t_ref[...]                # (8, N)    f32 (rows 3..7 zero)

    te = a_t.shape[1]
    n_nodes = coords_t.shape[1]

    # ---- attention2deltax MLP (transposed orientation; Dropout = identity)
    #      Linear -> LeakyReLU -> [Linear(dh->H) fused with Linear(H->1)]
    h_t = jnp.dot(w1t_ref[...], a_t,
                  preferred_element_type=jnp.float32) + b1t_ref[...]   # (dh, TE)
    h_t = jnp.where(h_t >= 0.0, h_t, 0.01 * h_t)                       # LeakyReLU
    # Fused second linear on VPU/XLU (avoids a 1-wide MXU output pass):
    scale = jnp.sum(h_t * w23_ref[...], axis=0, keepdims=True) + b23_ref[...]  # (1, TE)

    # ---- signed one-hot gather: coords[i] - coords[j] in a single MXU matmul
    node_ids_nt = lax.broadcasted_iota(jnp.int32, (n_nodes, te), 0)
    sgn = ((node_ids_nt == idx_i_row).astype(jnp.float32)
           - (node_ids_nt == idx_j_row).astype(jnp.float32))            # (N, TE)
    dx_t = jnp.dot(coords_t, sgn, preferred_element_type=jnp.float32)   # (8, TE)

    # ---- normalize (reference epsilon placement: 1 / (||dx|| + 1e-6)) & scale
    norm = jnp.sqrt(jnp.sum(dx_t * dx_t, axis=0, keepdims=True))        # (1, TE)
    delta_t = dx_t * (pl.reciprocal(norm + 1e-6, approx=True) * scale)  # (8, TE)

    # ---- scatter-sum over destination index i, lane-dense (8, N) accumulate
    node_ids_tn = lax.broadcasted_iota(jnp.int32, (te, n_nodes), 1)
    onehot_i_tn = (node_ids_tn == idx_i_col).astype(jnp.float32)        # (TE, N)
    out_ref[...] += jnp.dot(delta_t, onehot_i_tn,
                            preferred_element_type=jnp.float32)         # (8, N)


def _vmem_capacity_bytes():
    try:
        return int(pltpu.get_tpu_info().vmem_capacity_bytes)
    except Exception:
        return 128 * 1024 * 1024


def _per_edge_vmem_bytes(n_nodes, dim_dh, dh):
    # Conservative per-edge (per tile column) VMEM footprint:
    #   a_ij bf16 stream, double-buffered:            2 * 2 * dim_dh
    #   edge-index streams (3 x i32, double-buffered): 24
    #   (N, TE) iota / compares / signed one-hot:     ~16 * N
    #   (TE, N) iota / one-hot_i:                     ~8 * N
    #   (dh, TE) hidden activations + temporaries:    ~8 * dh
    #   (8, TE) / (1, TE) temporaries:                ~160
    return 4 * dim_dh + 24 + 24 * n_nodes + 8 * dh + 160


def _resident_vmem_bytes(n_nodes, dim_dh, dh):
    # coords_t8 (8,N), output block (8,N) + slack, weights / biases
    return 4 * (8 * n_nodes + 16 * n_nodes + dh * dim_dh + 3 * dh + 2)


def _pick_edge_tile(n_nodes, dim_dh, dh, n_edges, num_splits, cap):
    per_edge = _per_edge_vmem_bytes(n_nodes, dim_dh, dh)
    budget = int(0.55 * cap) - _resident_vmem_bytes(n_nodes, dim_dh, dh)
    te = max(128, min(4096, (budget // per_edge) // 128 * 128))
    # don't tile wider than the (per-split) edge count actually needs
    te_needed = int(pl.cdiv(int(pl.cdiv(n_edges, num_splits)), 128) * 128)
    return int(min(te, max(128, te_needed)))


def coords_update_pallas(a_ij, coords, edge_index, params, *,
                         edge_tile=None, num_splits=2):
    """a_ij: (E, D) f32; coords: (N, 3) f32; edge_index: (2, E) int."""
    E, D = a_ij.shape
    N = coords.shape[0]
    w1, b1, w2, b2, w3 = params
    dh = w1.shape[1]

    # Transposed / fused parameters (trace-time, tiny).
    w1t = jnp.asarray(w1, jnp.float32).T                                  # (dh, D)
    b1t = jnp.asarray(b1, jnp.float32).reshape(dh, 1)                     # (dh, 1)
    w23 = jnp.asarray(w2, jnp.float32) @ jnp.asarray(w3, jnp.float32)     # (dh, 1)
    b23 = (jnp.asarray(b2, jnp.float32) @ jnp.asarray(w3, jnp.float32)
           ).reshape(1, 1)                                                # (1, 1)

    cap = _vmem_capacity_bytes()               # 64 MiB (v7x) / 128 MiB (v5e, v6e)
    te = (edge_tile if edge_tile is not None
          else _pick_edge_tile(N, D, dh, E, num_splits, cap))

    tiles = int(pl.cdiv(E, te * num_splits)) * num_splits
    e_pad = tiles * te
    pad = e_pad - E
    tps = tiles // num_splits                  # edge tiles per core split

    # a_ij streamed in bf16, edges-on-lanes layout (wrapper-side layout plumbing).
    a_t = jnp.pad(a_ij.astype(jnp.bfloat16).T, ((0, 0), (0, pad)))        # (D, Ep)
    # Padded edges get index -1: one-hot columns/rows all-zero -> neutral.
    ei = jnp.pad(edge_index[0].astype(jnp.int32), (0, pad), constant_values=-1)
    ej = jnp.pad(edge_index[1].astype(jnp.int32), (0, pad), constant_values=-1)
    ei_row = ei.reshape(1, e_pad)
    ej_row = ej.reshape(1, e_pad)
    ei_col = ei.reshape(e_pad, 1)

    coords_f = coords.astype(jnp.float32)                                 # (N, 3)
    coords_t8 = jnp.zeros((8, N), jnp.float32).at[:3, :].set(coords_f.T)  # (8, N)

    per_edge = _per_edge_vmem_bytes(N, D, dh)
    est = _resident_vmem_bytes(N, D, dh) + te * per_edge + (2 << 20)
    vmem_limit = int(min(max(est, 32 * 1024 * 1024), int(0.8 * cap)))

    flops = int(2 * e_pad * D * dh + 3 * e_pad * dh         # MLP (fused 2nd linear)
                + 2 * 2 * e_pad * N * 8                     # signed gather + scatter
                + 48 * e_pad)                               # normalize / scale
    cost = pl.CostEstimate(
        flops=flops,
        transcendentals=int(2 * e_pad),
        bytes_accessed=int(2 * e_pad * D + 12 * e_pad
                           + 4 * (8 * N + num_splits * 8 * N
                                  + dh * D + 3 * dh + 2)),
    )

    grid = (num_splits, tps)

    kernel = pl.pallas_call(
        _coords_update_kernel,
        out_shape=jax.ShapeDtypeStruct((num_splits * 8, N), jnp.float32),
        grid_spec=pltpu.PrefetchScalarGridSpec(
            num_scalar_prefetch=0,
            grid=grid,
            in_specs=[
                pl.BlockSpec((D, te), lambda c, e: (0, c * tps + e)),   # a_ij^T bf16
                pl.BlockSpec((1, te), lambda c, e: (0, c * tps + e)),   # edge i (row)
                pl.BlockSpec((1, te), lambda c, e: (0, c * tps + e)),   # edge j (row)
                pl.BlockSpec((te, 1), lambda c, e: (c * tps + e, 0)),   # edge i (col)
                pl.BlockSpec((8, N), lambda c, e: (0, 0)),              # coords^T pad8
                pl.BlockSpec((dh, D), lambda c, e: (0, 0)),             # w1^T
                pl.BlockSpec((dh, 1), lambda c, e: (0, 0)),             # b1^T
                pl.BlockSpec((dh, 1), lambda c, e: (0, 0)),             # w2 @ w3
                pl.BlockSpec((1, 1), lambda c, e: (0, 0)),              # b2 @ w3
            ],
            out_specs=pl.BlockSpec((8, N), lambda c, e: (c, 0)),        # per-core acc
        ),
        compiler_params=pltpu.CompilerParams(
            dimension_semantics=("parallel", "arbitrary"),
            vmem_limit_bytes=vmem_limit,
        ),
        cost_estimate=cost,
    )
    partials = kernel(a_t, ei_row, ej_row, ei_col, coords_t8, w1t, b1t, w23, b23)

    # Combine per-core partial sums, slice xyz, and add coords (once, outside
    # the hot loop; keeps every in-kernel store lane-dense).
    acc = partials.reshape(num_splits, 8, N).sum(axis=0)                  # (8, N)
    return coords_f + acc[:3, :].T


def _reference(a_ij, coords, edge_index, params):
    w1, b1, w2, b2, w3 = params
    i, j = edge_index[0], edge_index[1]
    dx = coords[i] - coords[j]
    dx = dx / (jnp.linalg.norm(dx, axis=-1, keepdims=True) + 1e-6)
    h = a_ij @ w1 + b1
    h = jnp.where(h >= 0.0, h, 0.01 * h)
    att = h @ w2 + b2
    scale = att @ w3
    dx = dx * scale
    scattered = jax.ops.segment_sum(dx, i, num_segments=coords.shape[0])
    return coords + scattered


if __name__ == "__main__":
    key = jax.random.PRNGKey(0)
    N, E, D, H = 32, 200, 32, 4          # nodes, edges, dim_dh, num_head

    k = jax.random.split(key, 8)
    a_ij = jax.random.normal(k[0], (E, D), jnp.float32)
    coords = jax.random.normal(k[1], (N, 3), jnp.float32)
    edge_i = jax.random.randint(k[2], (E,), 0, N, jnp.int32)
    edge_j = jax.random.randint(k[3], (E,), 0, N, jnp.int32)
    edge_index = jnp.stack([edge_i, edge_j], axis=0)            # (2, E)

    # deterministic parameter init (shapes from the nn.Linear layers in __init__)
    w1 = jax.random.normal(k[4], (D, D // 2), jnp.float32) * 0.1
    b1 = jax.random.normal(k[5], (1, D // 2), jnp.float32) * 0.1
    w2 = jax.random.normal(k[6], (D // 2, H), jnp.float32) * 0.1
    b2 = jnp.zeros((1, H), jnp.float32)
    w3 = jax.random.normal(k[7], (H, 1), jnp.float32) * 0.1
    params = (w1, b1, w2, b2, w3)

    # edge_tile=128 exercises edge padding (200 -> 256), both core splits, and
    # the step-0 init / accumulate path.
    out = coords_update_pallas(a_ij, coords, edge_index, params, edge_tile=128)
    jax.block_until_ready(out)

    ref = _reference(a_ij, coords, edge_index, params)
    # tolerance loosened vs f32: bf16 a_ij stream + pl.reciprocal(approx=True)
    # + f32 reassociation contribute ~1e-3-level differences.
    assert jnp.allclose(out, ref, atol=2e-3, rtol=2e-3), "mismatch vs reference"
    print("KERNEL_OK")
</pallas_src>

<mosaic_0001>
module attributes {stable_mosaic.version = 11 : i64} {
  func.func @_coords_update_kernel(%arg0: i32, %arg1: i32, %arg2: memref<32x128xbf16, #tpu.memory_space<vmem>>, %arg3: memref<1x128xi32, #tpu.memory_space<vmem>>, %arg4: memref<1x128xi32, #tpu.memory_space<vmem>>, %arg5: memref<128x1xi32, #tpu.memory_space<vmem>>, %arg6: memref<8x32xf32, #tpu.memory_space<vmem>>, %arg7: memref<16x32xf32, #tpu.memory_space<vmem>>, %arg8: memref<16x1xf32, #tpu.memory_space<vmem>>, %arg9: memref<16x1xf32, #tpu.memory_space<vmem>>, %arg10: memref<1x1xf32, #tpu.memory_space<vmem>>, %arg11: memref<8x32xf32, #tpu.memory_space<vmem>>) attributes {dimension_semantics = [#tpu.dimension_semantics<parallel>, #tpu.dimension_semantics<arbitrary>], iteration_bounds = array<i64: 2, 1>, scalar_prefetch = 0 : i64, scratch_operands = 0 : i64, tpu.core_type = #tpu.core_type<tc>, window_params = [{transform_indices = @transform_0, window_bounds = array<i64: 32, 128>}, {transform_indices = @transform_1, window_bounds = array<i64: 1, 128>}, {transform_indices = @transform_2, window_bounds = array<i64: 1, 128>}, {transform_indices = @transform_3, window_bounds = array<i64: 128, 1>}, {pipeline_mode = #tpu.pipeline_mode<synchronous>, transform_indices = @transform_4, window_bounds = array<i64: 8, 32>}, {pipeline_mode = #tpu.pipeline_mode<synchronous>, transform_indices = @transform_5, window_bounds = array<i64: 16, 32>}, {pipeline_mode = #tpu.pipeline_mode<synchronous>, transform_indices = @transform_6, window_bounds = array<i64: 16, 1>}, {pipeline_mode = #tpu.pipeline_mode<synchronous>, transform_indices = @transform_7, window_bounds = array<i64: 16, 1>}, {pipeline_mode = #tpu.pipeline_mode<synchronous>, transform_indices = @transform_8, window_bounds = array<i64: 1, 1>}, {transform_indices = @transform_9, window_bounds = array<i64: 8, 32>}]} {
    %c0_i32 = arith.constant 0 : i32
    %0 = arith.cmpi eq, %arg1, %c0_i32 : i32
    %1 = arith.extui %0 : i1 to i32
    %c0_i32_0 = arith.constant 0 : i32
    %2 = arith.cmpi ne, %1, %c0_i32_0 : i32
    scf.if %2 {
      %cst_29 = arith.constant 0.000000e+00 : f32
      %57 = vector.broadcast %cst_29 : f32 to vector<8x32xf32>
      %c0_30 = arith.constant 0 : index
      %c0_31 = arith.constant 0 : index
      %58 = vector.load %arg11[%c0_30, %c0_31] : memref<8x32xf32, #tpu.memory_space<vmem>>, vector<8x32xf32>
      tpu.vector_store %arg11[%c0_30, %c0_31], %57 {strides = array<i32>} : memref<8x32xf32, #tpu.memory_space<vmem>>, vector<8x32xf32>,
    } else {
    }
    %c0 = arith.constant 0 : index
    %c0_1 = arith.constant 0 : index
    %3 = vector.load %arg2[%c0, %c0_1] : memref<32x128xbf16, #tpu.memory_space<vmem>>, vector<32x128xbf16>
    %4 = arith.extf %3 : vector<32x128xbf16> to vector<32x128xf32>
    %c0_2 = arith.constant 0 : index
    %c0_3 = arith.constant 0 : index
    %5 = vector.load %arg3[%c0_2, %c0_3] : memref<1x128xi32, #tpu.memory_space<vmem>>, vector<1x128xi32>
    %c0_4 = arith.constant 0 : index
    %c0_5 = arith.constant 0 : index
    %6 = vector.load %arg4[%c0_4, %c0_5] : memref<1x128xi32, #tpu.memory_space<vmem>>, vector<1x128xi32>
    %c0_6 = arith.constant 0 : index
    %c0_7 = arith.constant 0 : index
    %7 = vector.load %arg5[%c0_6, %c0_7] : memref<128x1xi32, #tpu.memory_space<vmem>>, vector<128x1xi32>
    %c0_8 = arith.constant 0 : index
    %c0_9 = arith.constant 0 : index
    %8 = vector.load %arg6[%c0_8, %c0_9] : memref<8x32xf32, #tpu.memory_space<vmem>>, vector<8x32xf32>
    %c0_10 = arith.constant 0 : index
    %c0_11 = arith.constant 0 : index
    %9 = vector.load %arg7[%c0_10, %c0_11] : memref<16x32xf32, #tpu.memory_space<vmem>>, vector<16x32xf32>
    %cst = arith.constant dense<0.000000e+00> : vector<16x128xf32>
    %10 = tpu.matmul %9, %4, %cst {dimension_numbers = #tpu.dot_dimension_numbers<[1], [0], [0], [1], [0, 0, 1, 1], [], []>} : vector<16x32xf32>, vector<32x128xf32>, vector<16x128xf32> -> vector<16x128xf32>
    %c0_12 = arith.constant 0 : index
    %c0_13 = arith.constant 0 : index
    %11 = vector.load %arg8[%c0_12, %c0_13] : memref<16x1xf32, #tpu.memory_space<vmem>>, vector<16x1xf32>
    %12 = vector.broadcast %11 : vector<16x1xf32> to vector<16x128xf32>
    %13 = arith.addf %10, %12 : vector<16x128xf32>
    %cst_14 = arith.constant 0.000000e+00 : f32
    %14 = vector.broadcast %cst_14 : f32 to vector<16x128xf32>
    %15 = arith.cmpf oge, %13, %14 : vector<16x128xf32>
    %cst_15 = arith.constant 0.00999999977 : f32
    %16 = vector.broadcast %cst_15 : f32 to vector<16x128xf32>
    %17 = arith.mulf %16, %13 : vector<16x128xf32>
    %18 = arith.select %15, %13, %17 : vector<16x128xi1>, vector<16x128xf32>
    %c0_16 = arith.constant 0 : index
    %c0_17 = arith.constant 0 : index
    %19 = vector.load %arg9[%c0_16, %c0_17] : memref<16x1xf32, #tpu.memory_space<vmem>>, vector<16x1xf32>
    %20 = vector.broadcast %19 : vector<16x1xf32> to vector<16x128xf32>
    %21 = arith.mulf %18, %20 : vector<16x128xf32>
    %cst_18 = arith.constant dense<0.000000e+00> : vector<128xf32>
    %22 = vector.multi_reduction <add>, %21, %cst_18 [0] : vector<16x128xf32> to vector<128xf32>
    %23 = vector.shape_cast %22 : vector<128xf32> to vector<1x128xf32>
    %c0_19 = arith.constant 0 : index
    %c0_20 = arith.constant 0 : index
    %24 = vector.load %arg10[%c0_19, %c0_20] : memref<1x1xf32, #tpu.memory_space<vmem>>, vector<1x1xf32>
    %25 = vector.broadcast %24 : vector<1x1xf32> to vector<1x128xf32>
    %26 = arith.addf %23, %25 : vector<1x128xf32>
    %27 = tpu.iota {dimensions = array<i32: 0>} : vector<32x128xi32>
    %28 = vector.broadcast %5 : vector<1x128xi32> to vector<32x128xi32>
    %29 = arith.cmpi eq, %27, %28 : vector<32x128xi32>
    %30 = arith.extui %29 : vector<32x128xi1> to vector<32x128xi32>
    %31 = arith.sitofp %30 : vector<32x128xi32> to vector<32x128xf32>
    %32 = vector.broadcast %6 : vector<1x128xi32> to vector<32x128xi32>
    %33 = arith.cmpi eq, %27, %32 : vector<32x128xi32>
    %34 = arith.extui %33 : vector<32x128xi1> to vector<32x128xi32>
    %35 = arith.sitofp %34 : vector<32x128xi32> to vector<32x128xf32>
    %36 = arith.subf %31, %35 : vector<32x128xf32>
    %cst_21 = arith.constant dense<0.000000e+00> : vector<8x128xf32>
    %37 = tpu.matmul %8, %36, %cst_21 {dimension_numbers = #tpu.dot_dimension_numbers<[1], [0], [0], [1], [0, 0, 1, 1], [], []>} : vector<8x32xf32>, vector<32x128xf32>, vector<8x128xf32> -> vector<8x128xf32>
    %38 = arith.mulf %37, %37 : vector<8x128xf32>
    %cst_22 = arith.constant dense<0.000000e+00> : vector<128xf32>
    %39 = vector.multi_reduction <add>, %38, %cst_22 [0] : vector<8x128xf32> to vector<128xf32>
    %40 = vector.shape_cast %39 : vector<128xf32> to vector<1x128xf32>
    %41 = math.sqrt %40 : vector<1x128xf32>
    %cst_23 = arith.constant 9.99999997E-7 : f32
    %42 = vector.broadcast %cst_23 : f32 to vector<1x128xf32>
    %43 = arith.addf %41, %42 : vector<1x128xf32>
    %44 = tpu.reciprocal %43 {approx = true} : vector<1x128xf32> -> vector<1x128xf32>
    %45 = arith.mulf %44, %26 : vector<1x128xf32>
    %46 = vector.broadcast %45 : vector<1x128xf32> to vector<8x128xf32>
    %47 = arith.mulf %37, %46 : vector<8x128xf32>
    %48 = tpu.iota {dimensions = array<i32: 1>} : vector<128x32xi32>
    %49 = vector.broadcast %7 : vector<128x1xi32> to vector<128x32xi32>
    %50 = arith.cmpi eq, %48, %49 : vector<128x32xi32>
    %51 = arith.extui %50 : vector<128x32xi1> to vector<128x32xi32>
    %52 = arith.sitofp %51 : vector<128x32xi32> to vector<128x32xf32>
    %c0_24 = arith.constant 0 : index
    %c0_25 = arith.constant 0 : index
    %53 = vector.load %arg11[%c0_24, %c0_25] : memref<8x32xf32, #tpu.memory_space<vmem>>, vector<8x32xf32>
    %cst_26 = arith.constant dense<0.000000e+00> : vector<8x32xf32>
    %54 = tpu.matmul %47, %52, %cst_26 {dimension_numbers = #tpu.dot_dimension_numbers<[1], [0], [0], [1], [0, 0, 1, 1], [], []>} : vector<8x128xf32>, vector<128x32xf32>, vector<8x32xf32> -> vector<8x32xf32>
    %55 = arith.addf %53, %54 : vector<8x32xf32>
    %c0_27 = arith.constant 0 : index
    %c0_28 = arith.constant 0 : index
    %56 = vector.load %arg11[%c0_27, %c0_28] : memref<8x32xf32, #tpu.memory_space<vmem>>, vector<8x32xf32>
    tpu.vector_store %arg11[%c0_27, %c0_28], %55 {strides = array<i32>} : memref<8x32xf32, #tpu.memory_space<vmem>>, vector<8x32xf32>,
    return
  }
  func.func @transform_0(%arg0: i32, %arg1: i32) -> (i32, i32) {
    %c1_i32 = arith.constant 1 : i32
    %0 = arith.muli %arg0, %c1_i32 : i32
    %1 = arith.addi %0, %arg1 : i32
    %c0_i32 = arith.constant 0 : i32
    %c0_i32_0 = arith.constant 0 : i32
    return %c0_i32, %1 : i32, i32
  }
  func.func @transform_1(%arg0: i32, %arg1: i32) -> (i32, i32) {
    %c1_i32 = arith.constant 1 : i32
    %0 = arith.muli %arg0, %c1_i32 : i32
    %1 = arith.addi %0, %arg1 : i32
    %c0_i32 = arith.constant 0 : i32
    %c0_i32_0 = arith.constant 0 : i32
    return %c0_i32, %1 : i32, i32
  }
  func.func @transform_2(%arg0: i32, %arg1: i32) -> (i32, i32) {
    %c1_i32 = arith.constant 1 : i32
    %0 = arith.muli %arg0, %c1_i32 : i32
    %1 = arith.addi %0, %arg1 : i32
    %c0_i32 = arith.constant 0 : i32
    %c0_i32_0 = arith.constant 0 : i32
    return %c0_i32, %1 : i32, i32
  }
  func.func @transform_3(%arg0: i32, %arg1: i32) -> (i32, i32) {
    %c1_i32 = arith.constant 1 : i32
    %0 = arith.muli %arg0, %c1_i32 : i32
    %1 = arith.addi %0, %arg1 : i32
    %c0_i32 = arith.constant 0 : i32
    %c0_i32_0 = arith.constant 0 : i32
    return %1, %c0_i32 : i32, i32
  }
  func.func @transform_4(%arg0: i32, %arg1: i32) -> (i32, i32) {
    %c0_i32 = arith.constant 0 : i32
    %c0_i32_0 = arith.constant 0 : i32
    %c0_i32_1 = arith.constant 0 : i32
    return %c0_i32, %c0_i32_0 : i32, i32
  }
  func.func @transform_5(%arg0: i32, %arg1: i32) -> (i32, i32) {
    %c0_i32 = arith.constant 0 : i32
    %c0_i32_0 = arith.constant 0 : i32
    %c0_i32_1 = arith.constant 0 : i32
    return %c0_i32, %c0_i32_0 : i32, i32
  }
  func.func @transform_6(%arg0: i32, %arg1: i32) -> (i32, i32) {
    %c0_i32 = arith.constant 0 : i32
    %c0_i32_0 = arith.constant 0 : i32
    %c0_i32_1 = arith.constant 0 : i32
    return %c0_i32, %c0_i32_0 : i32, i32
  }
  func.func @transform_7(%arg0: i32, %arg1: i32) -> (i32, i32) {
    %c0_i32 = arith.constant 0 : i32
    %c0_i32_0 = arith.constant 0 : i32
    %c0_i32_1 = arith.constant 0 : i32
    return %c0_i32, %c0_i32_0 : i32, i32
  }
  func.func @transform_8(%arg0: i32, %arg1: i32) -> (i32, i32) {
    %c0_i32 = arith.constant 0 : i32
    %c0_i32_0 = arith.constant 0 : i32
    %c0_i32_1 = arith.constant 0 : i32
    return %c0_i32, %c0_i32_0 : i32, i32
  }
  func.func @transform_9(%arg0: i32, %arg1: i32) -> (i32, i32) {
    %c0_i32 = arith.constant 0 : i32
    %c0_i32_0 = arith.constant 0 : i32
    return %arg0, %c0_i32 : i32, i32
  }
}

</mosaic_0001>

<bundles_post_ra>
// kernel: tpu_custom_call.1
= control target key start
LH: loop header
LB: loop body
LE: loop exit
PB: predicated region body
PF: predicated region fallthrough
CT: control target
= control target key end

     0   :  { %s1683_s0 = inlined_call_operand.vmem [shape: bf16[32,256], index: 0, kind: input, shape index: {}]   ;;  %s1684_s1 = inlined_call_operand.vmem [shape: s32[1,256], index: 1, kind: input, shape index: {}]   ;;  %s1685_s2 = inlined_call_operand.vmem [shape: s32[1,256], index: 2, kind: input, shape index: {}]   ;;  %s1686_s3 = inlined_call_operand.vmem [shape: s32[256,1], index: 3, kind: input, shape index: {}]   ;;  %s1687_s4 = inlined_call_operand.vmem [shape: f32[8,32], index: 4, kind: input, shape index: {}]   ;;  %s1688_s5 = inlined_call_operand.vmem [shape: f32[16,32], index: 5, kind: input, shape index: {}]   ;;  %s1689_s6 = inlined_call_operand.vmem [shape: f32[16,1], index: 6, kind: input, shape index: {}]   ;;  %s1690_s7 = inlined_call_operand.vmem [shape: f32[16,1], index: 7, kind: input, shape index: {}]   ;;  %s1691_s8 = inlined_call_operand.<no memory space> [shape: f32[1,1], index: 8, kind: input, shape index: {}]   ;;  %s1692_s9 = inlined_call_operand.hbm [shape: f32[16,32], index: 9, kind: output, shape index: {}]  }
   0x1   :  { %v14_v0 = vstv %s1691_s8 }
   0x2   :  { %15 = vst [vmem:[#allocation2] sm:$0x1] %v14_v0 }
   0x3   :  { %16 = vsyncpa [#allocation5], 0 }
   0x4   :  { %18 = vsyncpa [#allocation5 + $0x1], 0  ;;  %s1458_s11 = smov 0   ;;  %s1460_s12 = smov 0  }
   0x5   :  { %s1462_s13 = smov 0   ;;  %s1464_s14 = smov 0  }
   0x6   :  { %s1466_s15 = smov 0   ;;  %s1468_s16 = smov 0  }
   0x7 LB: > { %s1061_s8 = sadd.s32 4294967295, %s1397_s16   ;;  %s1062_s17 = sadd.s32 4294967294, %s1397_s16   ;;  %s1397_s16 = sphi %s1468_s16, %s24_s16   ;;  %s1393_s15 = sphi %s1466_s15, %s1699_s15   ;;  %s1389_s14 = sphi %s1464_s14, %s1698_s14   ;;  %s1385_s13 = sphi %s1462_s13, %s1697_s13   ;;  %s1381_s12 = sphi %s1460_s12, %s1696_s12   ;;  %s1377_s11 = sphi %s1458_s11, %s1695_s11  }
   0x8   : > { %s36_s18 = sadd.s32 1, %s1393_s15  ;;  %s45_s19 = sadd.s32 1, %s1385_s13 }
   0x9   : > { %p38_p0 = scmp.ge.s32.totalorder %s36_s18, 2  ;;  %p52_p1 = scmp.ne.s32.totalorder %s1385_s13, %s1381_s12 }
   0xa   : > { %p53_p2 = scmp.eq.s32.totalorder %s1397_s16, 0  ;;  %p271_p3 = scmp.eq.s32.totalorder %s1061_s8, 1 }
   0xb   : > { %s1701_s18 = smov (%p38_p0, %s36_s18), 0  ;;  %p276_p6 = scmp.ne.s32.totalorder %s1381_s12, %s1377_s11 }
   0xc   : > { %p54_p4 = por %p53_p2, %p52_p1  ;;  %p1497_p5 = por %p271_p3, %p52_p1 }
   0xd   : > { %s42_s21 = ssub.s32 %s1393_s15, %s1701_s18  ;;  %p277_p8 = scmp.eq.s32.totalorder %s1062_s17, 1 }
   0xe   : > { %p43_p7 = scmp.eq.s32.totalorder %s42_s21, 0  ;;  %p1064_p10 = scmp.ge.s32.totalorder %s1397_s16, 2 }
   0xf   : > { %p1508_p9 = por %p277_p8, %p276_p6 }
  0x10   : > { %s1506_s22 = scalar_select %p43_p7, %s1385_s13, %s45_s19  }
  0x11   : > { %308 = sbr.rel (%p1064_p10) target bundleno = 31 (0x1f), region = 36 }
  0x18   : > { %311 = sbr.rel (!%p54_p4) target bundleno = 31 (0x1f), region = 40  ;;  %s313_s24 = sand.u32 (%p54_p4), 1, %s1385_s13  }
  0x19   : > { %s1066_s25 = sshll.u32 (%p54_p4), %s1393_s15, 2  ;;  %s1065_s26 = sshll.u32 (%p54_p4), %s313_s24, 4 }
  0x1a   : > { %s318_s29 = scalar_lea.vmem (%p54_p4), %s1683_s0, %s1066_s25  ;;  %s315_s30 = scalar_lea.vmem (%p54_p4), [#allocation3], %s1065_s26 }
  0x1b   : > { %v334_v1 = vld [vmem:[%s318_s29] sm:$0xf] (%p54_p4)  ;;  %v336_v2 = vld [vmem:[%s318_s29 + $0x8] sm:$0xf] (%p54_p4)  ;;  %v338_v3 = vld [vmem:[%s318_s29 + $0x10] sm:$0xf] (%p54_p4) }
  0x1c   : > { %335 = vst [vmem:[%s315_s30] sm:$0xf] (%p54_p4), %v334_v1  ;;  %337 = vst [vmem:[%s315_s30 + $0x4] sm:$0xf] (%p54_p4), %v336_v2  ;;  %v340_v4 = vld [vmem:[%s318_s29 + $0x18] sm:$0xf] (%p54_p4) }
  0x1d   : > { %339 = vst [vmem:[%s315_s30 + $0x8] sm:$0xf] (%p54_p4), %v338_v3  ;;  %341 = vst [vmem:[%s315_s30 + $0xc] sm:$0xf] (%p54_p4), %v340_v4 }
  0x1f PF: > { %p1067_p11 = scmp.ge.s32.totalorder %s1397_s16, 1  ;;  %p398_p12 = scmp.lt.s32.totalorder %s1397_s16, 3 }
  0x21   : > { %p399_p13 = pnand %p1067_p11, %p398_p12 }
  0x22   : > { %s1523_s10 = sand.u32 (!%p399_p13), 1, %s1381_s12   ;;  %vm477_vm0 = vcmask (!%p399_p13), 261120   ;;  %v506_v5 = vld [vmem:[%s1688_s5] sm:$0xff] (!%p399_p13)  ;;  %p456_p0 = scmp.lt.s32.totalorder (!%p399_p13), %s1389_s14, 1  ;;  %v635_v6 = vlaneseq (!%p399_p13)  ;;  %v1399_v8 = vmov (!%p399_p13), 0.0|0.0   ;;  %v1400_v10 = vmov (!%p399_p13), 0  }
  0x23   : > { %402 = sbr.rel (%p399_p13) target bundleno = 546 (0x222), region = 93  ;;  %s1068_s19 = sshll.u32 (!%p399_p13), %s1523_s10, 4  ;;  %1166 = vmatprep.mubr.msk.f32.mxu1 (!%p399_p13), %vm477_vm0, %v506_v5  ;;  %v508_v7 = vld [vmem:[%s1689_s6] sm:$0xff] (!%p399_p13)  ;;  %1229 = vmatprep.subr.bf16.mxu0 (!%p399_p13), %v1399_v8  ;;  %v509_v11 = vld [vmem:[%s1689_s6 + $0x8] sm:$0xff] (!%p399_p13)  ;;  %vm1401_vm1 = vmmov (!%p399_p13), 0   ;;  %v1402_v15 = vmov (!%p399_p13), 0.0  }
  0x24   : > { %v1536_v9 = vshrl.u32 (!%p399_p13), %v635_v6, 7  ;;  %1313 = vset.pattern.permute.xlu0 (!%p399_p13), %v1400_v10  ;;  %1314 = vset.pattern.permute.xlu1 (!%p399_p13), %v1400_v10  ;;  %s1070_s27 = sshll.u32 (!%p399_p13), %s1389_s14, 4  ;;  %s407_s28 = scalar_lea.vmem (!%p399_p13), [#allocation3], %s1068_s19  ;;  %v507_v24 = vld [vmem:[%s1688_s5 + $0x8] sm:$0xff] (!%p399_p13)  ;;  %v505_v41 = vld [vmem:[%s1687_s4] sm:$0xff] (!%p399_p13)  ;;  %v773_v57 = vand.u32 (!%p399_p13), 127, %v635_v6 }
  0x25   : > { %v1122_v12 = vld [vmem:[%s407_s28] sm:$0xff] (!%p399_p13)   ;;  %v1129_v13 = vld [vmem:[%s407_s28 + $0x8] sm:$0xff] (!%p399_p13)   ;;  %512 = vperm.xlu0 (!%p399_p13), %1313, %v508_v7   ;;  %517 = vperm.xlu1 (!%p399_p13), %1314, %v509_v11   ;;  %p467_p1 = scmp.lt.s32.totalorder (!%p399_p13), %s1070_s27, 31  ;;  %v1403_v62 = vmov (!%p399_p13), 1.0|1.0   ;;  %s1069_s26 = sshll.u32 (!%p399_p13), %s1523_s10, 3 }
  0x26   : > { %1216 = vmatprep.subr.bf16.mxu1 (!%p399_p13), %v1122_v12  ;;  %v642_v14 = vadd.s32 (!%p399_p13), 8, %v1536_v9  ;;  %1212 = vmatprep.mubr.msk.f32.mxu0 (!%p399_p13), %vm1401_vm1, %v1402_v15  ;;  %v643_v16 = vadd.s32 (!%p399_p13), 16, %v1536_v9  ;;  %v644_v17 = vadd.s32 (!%p399_p13), 24, %v1536_v9  ;;  %v608_v42 = vld [vmem:[%s1690_s7] sm:$0xff] (!%p399_p13)  ;;  %v609_v43 = vld [vmem:[%s1690_s7 + $0x8] sm:$0xff] (!%p399_p13)  ;;  %s1613_s28 = scalar_lea.vmem (!%p399_p13), [#allocation4], %s1069_s26 }
  0x27   : > { %1218 = vmatpush3.bf16.msra.mxu1 (!%p399_p13), %v1122_v12  ;;  %v629_v52 = vld [vmem:[#allocation2] sm:$0x1] (!%p399_p13)  ;;  %478 = vst.msk [vmem:[%s1613_s28] sm:$0xff] (!%p399_p13), %vm477_vm0, %v1402_v15  ;;  %s957_s30 = sshll.u32 (!%p399_p13), %s1613_s28, 4  ;;  %s944_s19 = scalar_lea.sflag (!%p399_p13), [#allocation5], %s1523_s10  ;;  %s1634_s30 = int_to_ptr.vmem [resolvable:$true] %s957_s30 }
  0x28   : > { %1220 = vmatprep.subr.bf16.mxu1 (!%p399_p13), %v1129_v13  ;;  %s1319_s21 = scalar_lea.vmem (!%p399_p13), %s1634_s30, 128 }
  0x29   : > { %p1320_p2 = scmp.ne.s32.totalorder (!%p399_p13), %s1634_s30, %s1319_s21 }
  0x2a   : > { %s457_s29 = scalar_select %p456_p0, %s1389_s14, 1 }
  0x2b   : > { %s1703_s27 = smov (!%p467_p1, %s1070_s27), 31  ;;  %1222 = vmatpush3.bf16.msra.mxu1 %v1129_v13  ;;  %p1321_p3 = pnand %p1320_p2, %p1497_p5 }
  0x2c   : > { %s458_s17 = scalar_lea.vmem %s1684_s1, %s457_s29  ;;  %s463_s24 = scalar_lea.vmem %s1685_s2, %s457_s29  ;;  %1223 = vmatprep.subr.bf16.mxu1 %v1399_v8 }
  0x2d   : > { %v1074_v18 = vld [vmem:[%s458_s17] ss:$0 sm:$0xff]  ;;  %s1071_s25 = sshll.u32 %s1703_s27, 3  ;;  %s1118_s29 = sshll.u32 %s1389_s14, 7 }
  0x2e   : > { %v1079_v19 = vld [vmem:[%s463_s24] ss:$0 sm:$0xff]  ;;  %vm649_vm2 = vcmp.eq.s32.totalorder %v1536_v9, %v1074_v18  ;;  %vm650_vm3 = vcmp.eq.s32.totalorder %v642_v14, %v1074_v18  ;;  %vm651_vm6 = vcmp.eq.s32.totalorder %v643_v16, %v1074_v18  ;;  %vm652_vm7 = vcmp.eq.s32.totalorder %v644_v17, %v1074_v18  ;;  %s1568_s8 = scalar_lea.vmem %s1686_s3, %s1071_s25  ;;  %1167 = vmatmul.mubr.msk.f32.vlgmr.msra.gmra.mrb[0].mxu1 %vm477_vm0, %v507_v24  ;;  %s1632_s17 = scalar_lea.hbm %s1692_s9, %s1118_s29 }
  0x2f   : > { %vm665_vm4 = vcmp.eq.s32.totalorder %v1536_v9, %v1079_v19  ;;  %vm666_vm5 = vcmp.eq.s32.totalorder %v642_v14, %v1079_v19  ;;  %v1075_v20 = vsel %vm649_vm2, 1.0, %v1402_v15  ;;  %v1076_v21 = vsel %vm650_vm3, 1.0, %v1402_v15  ;;  %v489_v29 = vld [vmem:[%s1568_s8] sm:$0xff]  ;;  %v491_v30 = vld [vmem:[%s1568_s8 + $0x10] sm:$0xff]  ;;  %v490_v36 = vld [vmem:[%s1568_s8 + $0x8] sm:$0xff]  ;;  %1177 = vmatprep.mubr.msk.f32.mxu1 %vm1401_vm1, %v1402_v15  ;;  %p1322_p4 = pneg %p1321_p3  ;;  %s1404_s14 = smov [#allocation4]  }
  0x30   : > { %v1080_v22 = vsel %vm665_vm4, 1.0, %v1402_v15  ;;  %v1081_v23 = vsel %vm666_vm5, 1.0, %v1402_v15  ;;  %v1077_v27 = vsel %vm651_vm6, 1.0, %v1402_v15  ;;  %v1078_v28 = vsel %vm652_vm7, 1.0, %v1402_v15  ;;  %775 = vperm.xlu0 %1313, %v489_v29   ;;  %781 = vperm.xlu1 %1314, %v491_v30   ;;  %v492_v37 = vld [vmem:[%s1568_s8 + $0x18] sm:$0xff]  ;;  %v493_v39 = vld [vmem:[%s1568_s8 + $0x20] sm:$0xff] }
  0x31   : > { %v677_v25 = vsub.f32 %v1075_v20, %v1080_v22  ;;  %v678_v26 = vsub.f32 %v1076_v21, %v1081_v23  ;;  %vm667_vm8 = vcmp.eq.s32.totalorder %v643_v16, %v1079_v19  ;;  %vm668_vm9 = vcmp.eq.s32.totalorder %v644_v17, %v1079_v19  ;;  %v494_v40 = vld [vmem:[%s1568_s8 + $0x28] sm:$0xff]  ;;  %v495_v44 = vld [vmem:[%s1568_s8 + $0x30] sm:$0xff]  ;;  %v496_v45 = vld [vmem:[%s1568_s8 + $0x38] sm:$0xff]  ;;  %s1323_s24 = sshll.u32 %s1404_s14, 4  ;;  %s1324_s24 = int_to_ptr.vmem [resolvable:$false] %s1323_s24 }
  0x32   : > { %v1082_v32 = vsel %vm667_vm8, 1.0, %v1402_v15  ;;  %v1083_v33 = vsel %vm668_vm9, 1.0, %v1402_v15  ;;  %v497_v46 = vld [vmem:[%s1568_s8 + $0x40] sm:$0xff]  ;;  %v498_v47 = vld [vmem:[%s1568_s8 + $0x48] sm:$0xff]  ;;  %v499_v48 = vld [vmem:[%s1568_s8 + $0x50] sm:$0xff]  ;;  %s1325_s25 = scalar_lea.vmem %s1324_s24, 256  ;;  %p1326_p6 = scmp.lt.s32.totalorder %s1634_s30, %s1324_s24 }
  0x33   : > { %v1224_v31 = vpack.c.bf16 %v678_v26, %v677_v25  ;;  %v679_v34 = vsub.f32 %v1077_v27, %v1082_v32  ;;  %v680_v35 = vsub.f32 %v1078_v28, %v1083_v33  ;;  %v500_v49 = vld [vmem:[%s1568_s8 + $0x58] sm:$0xff]  ;;  %v501_v50 = vld [vmem:[%s1568_s8 + $0x60] sm:$0xff]  ;;  %v502_v51 = vld [vmem:[%s1568_s8 + $0x68] sm:$0xff]  ;;  %p1327_p7 = scmp.lt.s32.totalorder %s1325_s25, %s1319_s21 }
  0x34   : > { %778 = vperm.xlu0 %1313, %v490_v36   ;;  %784 = vperm.xlu1 %1314, %v492_v37   ;;  %v503_v53 = vld [vmem:[%s1568_s8 + $0x70] sm:$0xff]  ;;  %v504_v54 = vld [vmem:[%s1568_s8 + $0x78] sm:$0xff] }
  0x35   : > { %1225 = vmatpush3.bf16.msra.mxu1 %v1224_v31  ;;  %v1227_v38 = vpack.c.bf16 %v680_v35, %v679_v34  ;;  %v637_v35 = vsub.s32 0, %v1536_v9  ;;  %p1328_p8 = por %p1327_p7, %p1326_p6 }
  0x36   : > { %1226 = vmatprep.subr.bf16.mxu1 %v1399_v8 }
  0x37   : > { %p1329_p11 = pnand %p1328_p8, %p1322_p4 }
  0x38   : > { %787 = vperm.xlu0 %1313, %v493_v39   ;;  %790 = vperm.xlu1 %1314, %v494_v40  }
  0x39   : > { %1228 = vmatpush3.bf16.msra.mxu1 %v1227_v38 }
  0x3c   : > { %1178 = vmatmul.mubr.msk.f32.vlgmr.msra.gmra.mrb[2].mxu1 %vm477_vm0, %v505_v41  ;;  %612 = vperm.xlu0 %1313, %v608_v42  }
  0x3d   : > { %617 = vperm.xlu1 %1314, %v609_v43  }
  0x40   : > { %793 = vperm.xlu0 %1313, %v495_v44  }
  0x41   : > { %796 = vperm.xlu1 %1314, %v496_v45  }
  0x44   : > { %799 = vperm.xlu0 %1313, %v497_v46  }
  0x45   : > { %802 = vperm.xlu1 %1314, %v498_v47  }
  0x48   : > { %805 = vperm.xlu0 %1313, %v499_v48  }
  0x49   : > { %808 = vperm.xlu1 %1314, %v500_v49  }
  0x4c   : > { %811 = vperm.xlu0 %1313, %v501_v50  }
  0x4d   : > { %814 = vperm.xlu1 %1314, %v502_v51  }
  0x50   : > { %632 = vperm.xlu0 %1313, %v629_v52   ;;  %v870_v52 = vld [vmem:[%s1613_s28] sm:$0xff] }
  0x51   : > { %817 = vperm.xlu1 %1314, %v503_v53  }
  0x54   : > { %820 = vperm.xlu0 %1313, %v504_v54  }
  0xa4   : > { %v1605_v55 = vpop.permute.xlu0 %512  ;;  %v1607_v56 = vpop.permute.xlu1 %517 }
  0xaf   : > { %v776_v58 = vpop.permute.xlu0 %775  ;;  %v782_v59 = vpop.permute.xlu1 %781 }
  0xb0   : > { %vm822_vm10 = vcmp.eq.s32.totalorder %v773_v57, %v776_v58  ;;  %vm824_vm11 = vcmp.eq.s32.totalorder %v773_v57, %v782_v59 }
  0xb3   : > { %v779_v60 = vpop.permute.xlu0 %778  ;;  %v785_v61 = vpop.permute.xlu1 %784 }
  0xb4   : > { %vm823_vm12 = vcmp.eq.s32.totalorder %v773_v57, %v779_v60  ;;  %vm825_vm13 = vcmp.eq.s32.totalorder %v773_v57, %v785_v61 }
  0xb5   : > { %vm1230_vm14 = vmpackc.low %vm823_vm12, %vm822_vm10 }
  0xb6   : > { %1231 = vmatpush3.bf16.msk.msra.mxu0 %vm1230_vm14, %v1403_v62  ;;  %vm1233_vm15 = vmpackc.low %vm825_vm13, %vm824_vm11 }
  0xb7   : > { %v788_v63 = vpop.permute.xlu0 %787  ;;  %v791_v0 = vpop.permute.xlu1 %790  ;;  %1232 = vmatprep.subr.bf16.mxu0 %v1399_v8 }
  0xb8   : > { %vm826_vm1 = vcmp.eq.s32.totalorder %v773_v57, %v788_v63  ;;  %vm827_vm2 = vcmp.eq.s32.totalorder %v773_v57, %v791_v0 }
  0xb9   : > { %vm1236_vm3 = vmpackc.low %vm827_vm2, %vm826_vm1 }
  0xba   : > { %1234 = vmatpush3.bf16.msk.msra.mxu0 %vm1233_vm15, %v1403_v62 }
  0xbb   : > { %v613_v1 = vpop.permute.xlu0 %612  ;;  %1235 = vmatprep.subr.bf16.mxu0 %v1399_v8 }
  0xbc   : > { %v618_v2 = vpop.permute.xlu1 %617 }
  0xbe   : > { %1237 = vmatpush3.bf16.msk.msra.mxu0 %vm1236_vm3, %v1403_v62 }
  0xbf   : > { %v794_v3 = vpop.permute.xlu0 %793  ;;  %1238 = vmatprep.subr.bf16.mxu0 %v1399_v8 }
  0xc0   : > { %v797_v4 = vpop.permute.xlu1 %796  ;;  %vm828_vm4 = vcmp.eq.s32.totalorder %v773_v57, %v794_v3 }
  0xc1   : > { %vm829_vm5 = vcmp.eq.s32.totalorder %v773_v57, %v797_v4 }
  0xc2   : > { %vm1239_vm6 = vmpackc.low %vm829_vm5, %vm828_vm4 }
  0xc3   : > { %1240 = vmatpush3.bf16.msk.msra.mxu0 %vm1239_vm6, %v1403_v62  ;;  %v800_v5 = vpop.permute.xlu0 %799 }
  0xc4   : > { %v803_v6 = vpop.permute.xlu1 %802  ;;  %1241 = vmatprep.subr.bf16.mxu0 %v1399_v8  ;;  %vm830_vm7 = vcmp.eq.s32.totalorder %v773_v57, %v800_v5 }
  0xc5   : > { %vm831_vm8 = vcmp.eq.s32.totalorder %v773_v57, %v803_v6 }
  0xc6   : > { %vm1242_vm9 = vmpackc.low %vm831_vm8, %vm830_vm7 }
  0xc7   : > { %1243 = vmatpush3.bf16.msk.msra.mxu0 %vm1242_vm9, %v1403_v62  ;;  %v806_v7 = vpop.permute.xlu0 %805 }
  0xc8   : > { %v809_v10 = vpop.permute.xlu1 %808  ;;  %1244 = vmatprep.subr.bf16.mxu0 %v1399_v8  ;;  %vm832_vm10 = vcmp.eq.s32.totalorder %v773_v57, %v806_v7 }
  0xc9   : > { %vm833_vm11 = vcmp.eq.s32.totalorder %v773_v57, %v809_v10 }
  0xca   : > { %vm1245_vm12 = vmpackc.low %vm833_vm11, %vm832_vm10 }
  0xcb   : > { %1246 = vmatpush3.bf16.msk.msra.mxu0 %vm1245_vm12, %v1403_v62  ;;  %v812_v11 = vpop.permute.xlu0 %811 }
  0xcc   : > { %v815_v12 = vpop.permute.xlu1 %814  ;;  %1247 = vmatprep.subr.bf16.mxu0 %v1399_v8  ;;  %vm834_vm13 = vcmp.eq.s32.totalorder %v773_v57, %v812_v11 }
  0xcd   : > { %vm835_vm14 = vcmp.eq.s32.totalorder %v773_v57, %v815_v12 }
  0xce   : > { %vm1248_vm15 = vmpackc.low %vm835_vm14, %vm834_vm13 }
  0xcf   : > { %1249 = vmatpush3.bf16.msk.msra.mxu0 %vm1248_vm15, %v1403_v62  ;;  %v633_v13 = vpop.permute.xlu0 %632 }
  0xd0   : > { %v818_v14 = vpop.permute.xlu1 %817  ;;  %1250 = vmatprep.subr.bf16.mxu0 %v1399_v8  ;;  %v638_v41 = vrot.slane %v633_v13, %v637_v35 }
  0xd1   : > { %vm836_vm1 = vcmp.eq.s32.totalorder %v773_v57, %v818_v14 }
  0xd3   : > { %v821_v15 = vpop.permute.xlu0 %820 }
  0xd4   : > { %vm837_vm2 = vcmp.eq.s32.totalorder %v773_v57, %v821_v15 }
  0xd5   : > { %vm1251_vm3 = vmpackc.low %vm837_vm2, %vm836_vm1 }
  0xd6   : > { %1252 = vmatpush3.bf16.msk.msra.mxu0 %vm1251_vm3, %v1403_v62 }
 0x101   : > { %v1168_v16 = vpop.f32.mrb[0].mxu1 }
 0x102   : > { %v599_v17 = vadd.f32 %v1168_v16, %v1607_v56  ;;  %v593_v18 = vpop.f32.mrb[1].mxu1 }
 0x103   : > { %v594_v19 = vadd.f32 %v593_v18, %v1605_v55 }
 0x104   : > { %vm603_vm4 = vcmp.ge.f32.partialorder %v599_v17, 0.0  ;;  %v605_v20 = vmul.f32 0.01, %v599_v17 }
 0x105   : > { %vm602_vm5 = vcmp.ge.f32.partialorder %v594_v19, 0.0  ;;  %v604_v21 = vmul.f32 0.01, %v594_v19 }
 0x106   : > { %v607_v22 = vsel %vm603_vm4, %v599_v17, %v605_v20 }
 0x107   : > { %v621_v23 = vmul.f32 %v618_v2, %v607_v22  ;;  %v606_v24 = vsel %vm602_vm5, %v594_v19, %v604_v21 }
 0x108   : > { %v620_v25 = vmul.f32 %v613_v1, %v606_v24 }
 0x10a   : > { %v622_v26 = vadd.f32 %v621_v23, %v620_v25 }
 0x10c   : > { %v623_v29 = vrot.slane %v622_v26, 4 }
 0x10e   : > { %v624_v31 = vadd.f32 %v623_v29, %v622_v26 }
 0x10f   : > { %v750_v8 = vpop.f32.mrb[2].mxu1 }
 0x110   : > { %v754_v27 = vmul.f32 %v750_v8, %v750_v8  ;;  %v1179_v28 = vpop.f32.mrb[3].mxu1  ;;  %v625_v33 = vrot.slane %v624_v31, 2 }
 0x112   : > { %v755_v30 = vrot.slane %v754_v27, 4  ;;  %v626_v36 = vadd.f32 %v625_v33, %v624_v31 }
 0x114   : > { %v756_v32 = vadd.f32 %v755_v30, %v754_v27  ;;  %v627_v38 = vrot.slane %v626_v36, 1 }
 0x116   : > { %v757_v34 = vrot.slane %v756_v32, 2  ;;  %v628_v40 = vadd.f32 %v627_v38, %v626_v36 }
 0x118   : > { %v758_v37 = vadd.f32 %v757_v34, %v756_v32  ;;  %v639_v43 = vadd.f32 %v638_v41, %v628_v40 }
 0x11a   : > { %v759_v39 = vrot.slane %v758_v37, 1 }
 0x11c   : > { %v760_v42 = vadd.f32 %v759_v39, %v758_v37 }
 0x11e   : > { %1315 = vrsqrt.f32 %v760_v42  ;;  %vm763_vm6 = vcmp.eq.f32.partialorder %v760_v42, inf  ;;  %v766_v46 = vand.u32 2147483648, %v760_v42  ;;  %vm765_vm7 = vcmp.eq.f32.partialorder %v760_v42, 0.0 }
 0x128   : > { %v1316_v44 = vpop.eup %1315 }
 0x129   : > { %v762_v45 = vmul.f32 %v1316_v44, %v760_v42 }
 0x12b   : > { %v764_v47 = vsel %vm763_vm6, %v760_v42, %v762_v45 }
 0x12c   : > { %v767_v9 = vsel %vm765_vm7, %v766_v46, %v764_v47 }
 0x12d   : > { %v768_v48 = vadd.f32 1e-06, %v767_v9 }
 0x12f   : > { %1317 = vrcp.f32 %v768_v48 }
 0x139   : > { %v1318_v49 = vpop.eup %1317 }
 0x13a   : > { %v770_v50 = vmul.f32 %v1318_v49, %v639_v43 }
 0x13c   : > { %v771_v51 = vmul.f32 %v770_v50, %v750_v8 }
 0x13e   : > { %1213 = vmatmul.mubr.f32.vlgmr.msra.gmra.mrb[0].mxu0 %v771_v51 }
 0x211   : > { %v937_v53 = vpop.f32.mrb[0].mxu0 }
 0x212   : > { %v941_v54 = vadd.f32 %v937_v53, %v870_v52  ;;  %v1214_v55 = vpop.f32.mrb[1].mxu0 }
 0x214   : > { %942 = vst.msk [vmem:[%s1613_s28] sm:$0xff] %vm477_vm0, %v941_v54 }
 0x215   : > { %1332 = shalt.err (!%p1329_p11)
}
 0x216   : > { %s1333_s10 = scalar_lea.hbm %s1632_s17, 128  ;;  %s1337_s29 = scalar_lea.hbm %s1692_s9, 256 }
 0x217   : > { %p1334_p12 = scmp.ne.s32.totalorder %s1632_s17, %s1333_s10  ;;  %p1338_p1 = scmp.lt.u32.totalorder %s1632_s17, %s1692_s9 }
 0x218   : > { %p1339_p2 = scmp.lt.u32.totalorder %s1337_s29, %s1333_s10  ;;  %p1341_p4 = scmp.lt.u32.totalorder %s1333_s10, %s1632_s17 }
 0x219   : > { %p1335_p13 = pnand %p1334_p12, %p1497_p5 }
 0x21a   : > { %p1340_p3 = por %p1339_p2, %p1338_p1 }
 0x21b   : > { %p1336_p0 = pneg %p1335_p13 }
 0x21c   : > { %p1342_p6 = por %p1341_p4, %p1340_p3 }
 0x21e   : > { %p1343_p7 = pnand %p1342_p6, %p1336_p0 }
 0x220   : > { %1346 = shalt.err (!%p1343_p7)
}
 0x221   : > { %1253 = dma.vmem_to_hbm [thread:$0]  (%p1497_p5), %s1634_s30, 128, %s1632_s17, %s944_s19  }
 0x222 PF: > { %s969_s21 = sand.u32 1, %s1377_s11   ;;  %p1256_p8 = pnand %p1064_p10, %p1508_p9 }
 0x223   : > { %s970_s14 = scalar_lea.sflag [#allocation5], %s969_s21 }
 0x224   : > { %1372 = dma.done.wait (!%p1256_p8), %s970_s14, 128  }
 0x225   : > { %1374 = vsyncadd (!%p1256_p8), %s970_s14, 4294967168  ;;  %s24_s16 = sadd.s32 1, %s1397_s16   ;;  %s1695_s11 = smov %s1381_s12 }
 0x226   : > { %p21_p11 = scmp.ge.s32.totalorder %s24_s16, 4   ;;  %s1696_s12 = smov %s1385_s13 }
 0x227   : > { %s1697_s13 = smov %s1506_s22  ;;  %s1698_s14 = smov %s1393_s15 }
 0x228   : > { %s1699_s15 = smov %s1701_s18  ;;  %23 = sbr.rel (!%p21_p11) target bundleno = 7 (0x7), region = 150 }
 0x22f   :  { %975 = vsyncpa [#allocation5], 1 }
 0x230   :  { %977 = vsyncpa [#allocation5 + $0x1], 1 }

</bundles_post_ra>
